<compile_context>
chip_gen: v6e
topology: v6e:2x2x1
jax: 0.10.0
libtpu: 0.0.40
codegen_flags: <defaults>
</compile_context>

<pallas_src>
import functools

import jax
import jax.numpy as jnp
from jax.experimental import pallas as pl
from jax.experimental.pallas import tpu as pltpu


GIN_EPS = 0.0      # GINConv default eps (train_eps=False)
BN_EPS = 1e-5      # BatchNorm1d default eps


def _round_up(v, m):
    return ((v + m - 1) // m) * m


def _pad2d(a, rows, cols, dtype=None):
    dtype = a.dtype if dtype is None else dtype
    out = jnp.zeros((rows, cols), dtype)
    return out.at[:a.shape[0], :a.shape[1]].set(a.astype(dtype))


# ---------------------------------------------------------------------------
# Kernel body: one grid step == one GIN layer; final fc fused at last step.
# ---------------------------------------------------------------------------
def gin_extract_kernel(adj_ref, x_ref, valid_ref, w1_ref, w2_ref, vec_ref,
                       fcw_ref, fcb_ref, emb_ref, out_ref, h_scratch,
                       *, n_valid, gin_eps, bn_eps):
    layer = pl.program_id(0)
    num_layers = pl.num_programs(0)

    # Seed the VMEM-resident activation with the input features at layer 0.
    @pl.when(layer == 0)
    def _():
        h_scratch[...] = x_ref[...]

    adj = adj_ref[...]                         # [Np, Np] bf16 (exact 0/1)
    h = h_scratch[...]                         # [Np, D]  f32
    vrow = valid_ref[...]                      # [8, Np]  f32, row 0 = validity
    inv_n = 1.0 / float(n_valid)

    w1 = w1_ref[0]                             # [D, D] bf16
    w2 = w2_ref[0]                             # [D, D] bf16
    vec = vec_ref[0]                           # [8, D] f32: b1,gamma,beta,b2,0...
    b1 = vec[0:1, :]
    gamma = vec[1:2, :]
    beta = vec[2:3, :]
    b2 = vec[3:4, :]

    # GIN update with W1 hoisted through the (linear) aggregation:
    #   ((1+eps)x + A x) W1 + b1 == (1+eps)(x W1) + A (x W1) + b1
    xw = jnp.dot(h.astype(jnp.bfloat16), w1,
                 preferred_element_type=jnp.float32)                 # [Np, D]
    agg = jnp.dot(adj, xw.astype(jnp.bfloat16),
                  preferred_element_type=jnp.float32)                # [Np, D]
    t = (1.0 + gin_eps) * xw + agg + b1

    # BatchNorm1d (training-mode batch stats, biased variance) over the valid
    # node rows only.  Reductions are done on the MXU via the validity row
    # vector instead of axis=0 XLU sums; all stats math stays f32.
    mean = jnp.dot(vrow, t, preferred_element_type=jnp.float32)[0:1, :] * inv_n
    cent = t - mean
    var = jnp.dot(vrow, cent * cent,
                  preferred_element_type=jnp.float32)[0:1, :] * inv_n
    t = gamma * cent * jax.lax.rsqrt(var + bn_eps) + beta
    t = jnp.maximum(t, 0.0)                                           # ReLU

    # Second Linear + ReLU
    t = jnp.dot(t.astype(jnp.bfloat16), w2,
                preferred_element_type=jnp.float32) + b2
    h_new = jnp.maximum(t, 0.0)
    h_scratch[...] = h_new

    # Final layer: emit embedding and fused fc logits.
    @pl.when(layer == num_layers - 1)
    def _():
        emb_ref[...] = h_new
        out_ref[...] = (
            jnp.dot(h_new.astype(jnp.bfloat16), fcw_ref[...],
                    preferred_element_type=jnp.float32)
            + fcb_ref[...]
        )


# ---------------------------------------------------------------------------
# Wrapper: pad to lane-dense shapes, stack per-layer params, layer-grid call.
# ---------------------------------------------------------------------------
def gin_extract_forward(params, x, edge_index, num_nodes):
    """Mirrors GinExtract.forward: returns (embedding, logits)."""
    in_dim = x.shape[1]
    hidden_dim = [layer["w2"].shape[1] for layer in params["layers"]]
    out_dim = params["fc"]["w"].shape[1]
    num_layers = len(params["layers"])

    d_pad = _round_up(max([in_dim] + hidden_dim + [out_dim]), 128)
    n_pad = _round_up(num_nodes, 16)          # bf16 sublane tile for adj

    # Dense adjacency: A[target, source] = 1 per edge (duplicate edges add,
    # matching sum aggregation over a multigraph). bf16 halves the dominant
    # N^2 operand; 0/1 counts are exact in bf16.
    src, dst = edge_index[0], edge_index[1]
    adj = jnp.zeros((n_pad, n_pad), jnp.float32).at[dst, src].add(1.0)
    adj = adj.astype(jnp.bfloat16)

    x_p = _pad2d(x, n_pad, d_pad, jnp.float32)

    # Node-validity row mask (row 0 of an 8-row slab, MXU-friendly).
    valid = jnp.zeros((8, n_pad), jnp.float32).at[0, :num_nodes].set(1.0)

    # Per-layer weights stacked [L, D, D] (bf16); per-layer 1xD vectors packed
    # into one [L, 8, D] f32 slab (rows: b1, gamma, beta, b2, then zeros).
    w1_stack = jnp.stack(
        [_pad2d(l["w1"], d_pad, d_pad, jnp.bfloat16) for l in params["layers"]])
    w2_stack = jnp.stack(
        [_pad2d(l["w2"], d_pad, d_pad, jnp.bfloat16) for l in params["layers"]])
    vec_stack = jnp.stack([
        jnp.concatenate([_pad2d(l["b1"], 1, d_pad, jnp.float32),
                         _pad2d(l["gamma"], 1, d_pad, jnp.float32),
                         _pad2d(l["beta"], 1, d_pad, jnp.float32),
                         _pad2d(l["b2"], 1, d_pad, jnp.float32),
                         jnp.zeros((4, d_pad), jnp.float32)], axis=0)
        for l in params["layers"]])
    fc_w = _pad2d(params["fc"]["w"], d_pad, d_pad, jnp.bfloat16)
    fc_b = _pad2d(params["fc"]["b"], 1, d_pad, jnp.float32)

    kernel = functools.partial(
        gin_extract_kernel, n_valid=num_nodes, gin_eps=GIN_EPS, bn_eps=BN_EPS)

    # VMEM budget: resident inputs + double-buffered per-layer weights +
    # outputs + h scratch, with margin; capped at v7x's 64 MiB physical VMEM.
    def _nb(shape, dt):
        return int(jnp.dtype(dt).itemsize) * int(jnp.prod(jnp.array(shape)))
    resident = (_nb((n_pad, n_pad), jnp.bfloat16)      # adj
                + _nb((n_pad, d_pad), jnp.float32)     # x
                + _nb((8, n_pad), jnp.float32)         # valid
                + _nb((d_pad, d_pad), jnp.bfloat16)    # fc_w
                + _nb((1, d_pad), jnp.float32)         # fc_b
                + 3 * _nb((n_pad, d_pad), jnp.float32))  # emb, out, h scratch
    per_layer = 2 * (2 * _nb((d_pad, d_pad), jnp.bfloat16)   # w1, w2 x2 bufs
                     + _nb((8, d_pad), jnp.float32))
    vmem_limit = int(min(64 * 1024 * 1024,
                         max(8 * 1024 * 1024, 2 * (resident + per_layer))))

    grid_spec = pltpu.PrefetchScalarGridSpec(
        num_scalar_prefetch=0,
        grid=(num_layers,),
        in_specs=[
            pl.BlockSpec((n_pad, n_pad), lambda l: (0, 0)),      # adj
            pl.BlockSpec((n_pad, d_pad), lambda l: (0, 0)),      # x
            pl.BlockSpec((8, n_pad), lambda l: (0, 0)),          # valid mask
            pl.BlockSpec((1, d_pad, d_pad), lambda l: (l, 0, 0)),  # w1[l]
            pl.BlockSpec((1, d_pad, d_pad), lambda l: (l, 0, 0)),  # w2[l]
            pl.BlockSpec((1, 8, d_pad), lambda l: (l, 0, 0)),      # vec[l]
            pl.BlockSpec((d_pad, d_pad), lambda l: (0, 0)),      # fc_w
            pl.BlockSpec((1, d_pad), lambda l: (0, 0)),          # fc_b
        ],
        out_specs=(
            pl.BlockSpec((n_pad, d_pad), lambda l: (0, 0)),      # embedding
            pl.BlockSpec((n_pad, d_pad), lambda l: (0, 0)),      # logits
        ),
        scratch_shapes=[pltpu.VMEM((n_pad, d_pad), jnp.float32)],  # h carry
    )

    emb_p, out_p = pl.pallas_call(
        kernel,
        out_shape=(jax.ShapeDtypeStruct((n_pad, d_pad), jnp.float32),
                   jax.ShapeDtypeStruct((n_pad, d_pad), jnp.float32)),
        grid_spec=grid_spec,
        compiler_params=pltpu.CompilerParams(
            dimension_semantics=("arbitrary",),
            vmem_limit_bytes=vmem_limit),
    )(adj, x_p, valid, w1_stack, w2_stack, vec_stack, fc_w, fc_b)

    embedding = emb_p[:num_nodes, :hidden_dim[-1]]
    logits = out_p[:num_nodes, :out_dim]
    return embedding, logits


# ---------------------------------------------------------------------------
# Parameter construction (deterministic, synthetic — not a checkpoint load)
# ---------------------------------------------------------------------------
def make_params(key, in_dim, out_dim, hidden_dim):
    dims = [in_dim] + list(hidden_dim)
    params = {"layers": [], "fc": None}
    for i in range(len(hidden_dim)):
        d_in, d_out = dims[i], dims[i + 1]
        key, k1, k2, k3, k4 = jax.random.split(key, 5)
        layer = {
            # Linear(d_in, d_in): stored as [in, out] for x @ W
            "w1": jax.random.normal(k1, (d_in, d_in), jnp.float32) * 0.1,
            "b1": jax.random.normal(k2, (1, d_in), jnp.float32) * 0.1,
            # BatchNorm1d(d_in) affine params
            "gamma": jnp.ones((1, d_in), jnp.float32),
            "beta": jnp.zeros((1, d_in), jnp.float32),
            # Linear(d_in, d_out)
            "w2": jax.random.normal(k3, (d_in, d_out), jnp.float32) * 0.1,
            "b2": jax.random.normal(k4, (1, d_out), jnp.float32) * 0.1,
        }
        params["layers"].append(layer)
    key, k1, k2 = jax.random.split(key, 3)
    params["fc"] = {
        "w": jax.random.normal(k1, (hidden_dim[-1], out_dim), jnp.float32) * 0.1,
        "b": jax.random.normal(k2, (1, out_dim), jnp.float32) * 0.1,
    }
    return params


# ---------------------------------------------------------------------------
if __name__ == "__main__":
    key = jax.random.PRNGKey(0)

    # Small synthetic graph.
    num_nodes = 16
    num_edges = 32
    in_dim = 8
    hidden_dim = [64, 32]
    out_dim = 16

    key, kx, ke, kp = jax.random.split(key, 4)
    x = jax.random.normal(kx, (num_nodes, in_dim), jnp.float32)
    edge_index = jax.random.randint(ke, (2, num_edges), 0, num_nodes,
                                    dtype=jnp.int32)

    params = make_params(kp, in_dim, out_dim, hidden_dim)

    embedding, logits = gin_extract_forward(params, x, edge_index, num_nodes)
    jax.block_until_ready((embedding, logits))

    assert embedding.shape == (num_nodes, hidden_dim[-1])
    assert logits.shape == (num_nodes, out_dim)
    print("KERNEL_OK")
</pallas_src>

<mosaic_0001>
module attributes {stable_mosaic.version = 11 : i64} {
  func.func @gin_extract_kernel(%arg0: i32, %arg1: memref<16x16xbf16, #tpu.memory_space<vmem>>, %arg2: memref<16x128xf32, #tpu.memory_space<vmem>>, %arg3: memref<8x16xf32, #tpu.memory_space<vmem>>, %arg4: memref<1x128x128xbf16, #tpu.memory_space<vmem>>, %arg5: memref<1x128x128xbf16, #tpu.memory_space<vmem>>, %arg6: memref<1x8x128xf32, #tpu.memory_space<vmem>>, %arg7: memref<128x128xbf16, #tpu.memory_space<vmem>>, %arg8: memref<1x128xf32, #tpu.memory_space<vmem>>, %arg9: memref<16x128xf32, #tpu.memory_space<vmem>>, %arg10: memref<16x128xf32, #tpu.memory_space<vmem>>, %arg11: memref<16x128xf32, #tpu.memory_space<vmem>>) attributes {dimension_semantics = [#tpu.dimension_semantics<arbitrary>], iteration_bounds = array<i64: 2>, scalar_prefetch = 0 : i64, scratch_operands = 1 : i64, tpu.core_type = #tpu.core_type<tc>, window_params = [{pipeline_mode = #tpu.pipeline_mode<synchronous>, transform_indices = @transform_0, window_bounds = array<i64: 16, 16>}, {pipeline_mode = #tpu.pipeline_mode<synchronous>, transform_indices = @transform_1, window_bounds = array<i64: 16, 128>}, {pipeline_mode = #tpu.pipeline_mode<synchronous>, transform_indices = @transform_2, window_bounds = array<i64: 8, 16>}, {transform_indices = @transform_3, window_bounds = array<i64: 1, 128, 128>}, {transform_indices = @transform_4, window_bounds = array<i64: 1, 128, 128>}, {transform_indices = @transform_5, window_bounds = array<i64: 1, 8, 128>}, {pipeline_mode = #tpu.pipeline_mode<synchronous>, transform_indices = @transform_6, window_bounds = array<i64: 128, 128>}, {pipeline_mode = #tpu.pipeline_mode<synchronous>, transform_indices = @transform_7, window_bounds = array<i64: 1, 128>}, {pipeline_mode = #tpu.pipeline_mode<synchronous>, transform_indices = @transform_8, window_bounds = array<i64: 16, 128>}, {pipeline_mode = #tpu.pipeline_mode<synchronous>, transform_indices = @transform_9, window_bounds = array<i64: 16, 128>}]} {
    %c0_i32 = arith.constant 0 : i32
    %0 = arith.cmpi eq, %arg0, %c0_i32 : i32
    %1 = arith.extui %0 : i1 to i32
    %c0_i32_0 = arith.constant 0 : i32
    %2 = arith.cmpi ne, %1, %c0_i32_0 : i32
    scf.if %2 {
      %c0_28 = arith.constant 0 : index
      %c0_29 = arith.constant 0 : index
      %57 = vector.load %arg2[%c0_28, %c0_29] : memref<16x128xf32, #tpu.memory_space<vmem>>, vector<16x128xf32>
      %c0_30 = arith.constant 0 : index
      %c0_31 = arith.constant 0 : index
      %58 = vector.load %arg11[%c0_30, %c0_31] : memref<16x128xf32, #tpu.memory_space<vmem>>, vector<16x128xf32>
      tpu.vector_store %arg11[%c0_30, %c0_31], %57 {strides = array<i32>} : memref<16x128xf32, #tpu.memory_space<vmem>>, vector<16x128xf32>,
    } else {
    }
    %c0 = arith.constant 0 : index
    %c0_1 = arith.constant 0 : index
    %3 = vector.load %arg1[%c0, %c0_1] : memref<16x16xbf16, #tpu.memory_space<vmem>>, vector<16x16xbf16>
    %c0_2 = arith.constant 0 : index
    %c0_3 = arith.constant 0 : index
    %4 = vector.load %arg11[%c0_2, %c0_3] : memref<16x128xf32, #tpu.memory_space<vmem>>, vector<16x128xf32>
    %c0_4 = arith.constant 0 : index
    %c0_5 = arith.constant 0 : index
    %5 = vector.load %arg3[%c0_4, %c0_5] : memref<8x16xf32, #tpu.memory_space<vmem>>, vector<8x16xf32>
    %c0_6 = arith.constant 0 : index
    %c0_7 = arith.constant 0 : index
    %c0_8 = arith.constant 0 : index
    %6 = vector.load %arg4[%c0_6, %c0_7, %c0_8] : memref<1x128x128xbf16, #tpu.memory_space<vmem>>, vector<1x128x128xbf16>
    %7 = vector.shape_cast %6 : vector<1x128x128xbf16> to vector<128x128xbf16>
    %c0_9 = arith.constant 0 : index
    %c0_10 = arith.constant 0 : index
    %c0_11 = arith.constant 0 : index
    %8 = vector.load %arg5[%c0_9, %c0_10, %c0_11] : memref<1x128x128xbf16, #tpu.memory_space<vmem>>, vector<1x128x128xbf16>
    %9 = vector.shape_cast %8 : vector<1x128x128xbf16> to vector<128x128xbf16>
    %c0_12 = arith.constant 0 : index
    %c0_13 = arith.constant 0 : index
    %c0_14 = arith.constant 0 : index
    %10 = vector.load %arg6[%c0_12, %c0_13, %c0_14] : memref<1x8x128xf32, #tpu.memory_space<vmem>>, vector<1x8x128xf32>
    %11 = vector.shape_cast %10 : vector<1x8x128xf32> to vector<8x128xf32>
    %12 = vector.extract_strided_slice %11 {offsets = [0, 0], sizes = [1, 128], strides = [1, 1]} : vector<8x128xf32> to vector<1x128xf32>
    %13 = vector.extract_strided_slice %11 {offsets = [1, 0], sizes = [1, 128], strides = [1, 1]} : vector<8x128xf32> to vector<1x128xf32>
    %14 = vector.extract_strided_slice %11 {offsets = [2, 0], sizes = [1, 128], strides = [1, 1]} : vector<8x128xf32> to vector<1x128xf32>
    %15 = vector.extract_strided_slice %11 {offsets = [3, 0], sizes = [1, 128], strides = [1, 1]} : vector<8x128xf32> to vector<1x128xf32>
    %16 = arith.truncf %4 : vector<16x128xf32> to vector<16x128xbf16>
    %cst = arith.constant dense<0.000000e+00> : vector<16x128xf32>
    %17 = tpu.matmul %16, %7, %cst {dimension_numbers = #tpu.dot_dimension_numbers<[1], [0], [0], [1], [0, 0, 1, 1], [], []>} : vector<16x128xbf16>, vector<128x128xbf16>, vector<16x128xf32> -> vector<16x128xf32>
    %18 = arith.truncf %17 : vector<16x128xf32> to vector<16x128xbf16>
    %cst_15 = arith.constant dense<0.000000e+00> : vector<16x128xf32>
    %19 = tpu.matmul %3, %18, %cst_15 {dimension_numbers = #tpu.dot_dimension_numbers<[1], [0], [0], [1], [0, 0, 1, 1], [], []>} : vector<16x16xbf16>, vector<16x128xbf16>, vector<16x128xf32> -> vector<16x128xf32>
    %cst_16 = arith.constant 1.000000e+00 : f32
    %20 = vector.broadcast %cst_16 : f32 to vector<16x128xf32>
    %21 = arith.mulf %20, %17 : vector<16x128xf32>
    %22 = arith.addf %21, %19 : vector<16x128xf32>
    %23 = vector.broadcast %12 : vector<1x128xf32> to vector<16x128xf32>
    %24 = arith.addf %22, %23 : vector<16x128xf32>
    %cst_17 = arith.constant dense<0.000000e+00> : vector<8x128xf32>
    %25 = tpu.matmul %5, %24, %cst_17 {dimension_numbers = #tpu.dot_dimension_numbers<[1], [0], [0], [1], [0, 0, 1, 1], [], []>} : vector<8x16xf32>, vector<16x128xf32>, vector<8x128xf32> -> vector<8x128xf32>
    %26 = vector.extract_strided_slice %25 {offsets = [0, 0], sizes = [1, 128], strides = [1, 1]} : vector<8x128xf32> to vector<1x128xf32>
    %cst_18 = arith.constant 6.250000e-02 : f32
    %27 = vector.broadcast %cst_18 : f32 to vector<1x128xf32>
    %28 = arith.mulf %26, %27 : vector<1x128xf32>
    %29 = vector.broadcast %28 : vector<1x128xf32> to vector<16x128xf32>
    %30 = arith.subf %24, %29 : vector<16x128xf32>
    %31 = arith.mulf %30, %30 : vector<16x128xf32>
    %cst_19 = arith.constant dense<0.000000e+00> : vector<8x128xf32>
    %32 = tpu.matmul %5, %31, %cst_19 {dimension_numbers = #tpu.dot_dimension_numbers<[1], [0], [0], [1], [0, 0, 1, 1], [], []>} : vector<8x16xf32>, vector<16x128xf32>, vector<8x128xf32> -> vector<8x128xf32>
    %33 = vector.extract_strided_slice %32 {offsets = [0, 0], sizes = [1, 128], strides = [1, 1]} : vector<8x128xf32> to vector<1x128xf32>
    %cst_20 = arith.constant 6.250000e-02 : f32
    %34 = vector.broadcast %cst_20 : f32 to vector<1x128xf32>
    %35 = arith.mulf %33, %34 : vector<1x128xf32>
    %36 = vector.broadcast %13 : vector<1x128xf32> to vector<16x128xf32>
    %37 = arith.mulf %36, %30 : vector<16x128xf32>
    %cst_21 = arith.constant 9.99999974E-6 : f32
    %38 = vector.broadcast %cst_21 : f32 to vector<1x128xf32>
    %39 = arith.addf %35, %38 : vector<1x128xf32>
    %40 = math.rsqrt %39 : vector<1x128xf32>
    %41 = vector.broadcast %40 : vector<1x128xf32> to vector<16x128xf32>
    %42 = arith.mulf %37, %41 : vector<16x128xf32>
    %43 = vector.broadcast %14 : vector<1x128xf32> to vector<16x128xf32>
    %44 = arith.addf %42, %43 : vector<16x128xf32>
    %cst_22 = arith.constant 0.000000e+00 : f32
    %45 = vector.broadcast %cst_22 : f32 to vector<16x128xf32>
    %46 = arith.maximumf %44, %45 : vector<16x128xf32>
    %47 = arith.truncf %46 : vector<16x128xf32> to vector<16x128xbf16>
    %cst_23 = arith.constant dense<0.000000e+00> : vector<16x128xf32>
    %48 = tpu.matmul %47, %9, %cst_23 {dimension_numbers = #tpu.dot_dimension_numbers<[1], [0], [0], [1], [0, 0, 1, 1], [], []>} : vector<16x128xbf16>, vector<128x128xbf16>, vector<16x128xf32> -> vector<16x128xf32>
    %49 = vector.broadcast %15 : vector<1x128xf32> to vector<16x128xf32>
    %50 = arith.addf %48, %49 : vector<16x128xf32>
    %cst_24 = arith.constant 0.000000e+00 : f32
    %51 = vector.broadcast %cst_24 : f32 to vector<16x128xf32>
    %52 = arith.maximumf %50, %51 : vector<16x128xf32>
    %c0_25 = arith.constant 0 : index
    %c0_26 = arith.constant 0 : index
    %53 = vector.load %arg11[%c0_25, %c0_26] : memref<16x128xf32, #tpu.memory_space<vmem>>, vector<16x128xf32>
    tpu.vector_store %arg11[%c0_25, %c0_26], %52 {strides = array<i32>} : memref<16x128xf32, #tpu.memory_space<vmem>>, vector<16x128xf32>,
    %c1_i32 = arith.constant 1 : i32
    %54 = arith.cmpi eq, %arg0, %c1_i32 : i32
    %55 = arith.extui %54 : i1 to i32
    %c0_i32_27 = arith.constant 0 : i32
    %56 = arith.cmpi ne, %55, %c0_i32_27 : i32
    scf.if %56 {
      %c0_28 = arith.constant 0 : index
      %c0_29 = arith.constant 0 : index
      %57 = vector.load %arg9[%c0_28, %c0_29] : memref<16x128xf32, #tpu.memory_space<vmem>>, vector<16x128xf32>
      tpu.vector_store %arg9[%c0_28, %c0_29], %52 {strides = array<i32>} : memref<16x128xf32, #tpu.memory_space<vmem>>, vector<16x128xf32>,
      %58 = arith.truncf %52 : vector<16x128xf32> to vector<16x128xbf16>
      %c0_30 = arith.constant 0 : index
      %c0_31 = arith.constant 0 : index
      %59 = vector.load %arg7[%c0_30, %c0_31] : memref<128x128xbf16, #tpu.memory_space<vmem>>, vector<128x128xbf16>
      %cst_32 = arith.constant dense<0.000000e+00> : vector<16x128xf32>
      %60 = tpu.matmul %58, %59, %cst_32 {dimension_numbers = #tpu.dot_dimension_numbers<[1], [0], [0], [1], [0, 0, 1, 1], [], []>} : vector<16x128xbf16>, vector<128x128xbf16>, vector<16x128xf32> -> vector<16x128xf32>
      %c0_33 = arith.constant 0 : index
      %c0_34 = arith.constant 0 : index
      %61 = vector.load %arg8[%c0_33, %c0_34] : memref<1x128xf32, #tpu.memory_space<vmem>>, vector<1x128xf32>
      %62 = vector.broadcast %61 : vector<1x128xf32> to vector<16x128xf32>
      %63 = arith.addf %60, %62 : vector<16x128xf32>
      %c0_35 = arith.constant 0 : index
      %c0_36 = arith.constant 0 : index
      %64 = vector.load %arg10[%c0_35, %c0_36] : memref<16x128xf32, #tpu.memory_space<vmem>>, vector<16x128xf32>
      tpu.vector_store %arg10[%c0_35, %c0_36], %63 {strides = array<i32>} : memref<16x128xf32, #tpu.memory_space<vmem>>, vector<16x128xf32>,
    } else {
    }
    return
  }
  func.func @transform_0(%arg0: i32) -> (i32, i32) {
    %c0_i32 = arith.constant 0 : i32
    %c0_i32_0 = arith.constant 0 : i32
    %c0_i32_1 = arith.constant 0 : i32
    return %c0_i32, %c0_i32_0 : i32, i32
  }
  func.func @transform_1(%arg0: i32) -> (i32, i32) {
    %c0_i32 = arith.constant 0 : i32
    %c0_i32_0 = arith.constant 0 : i32
    %c0_i32_1 = arith.constant 0 : i32
    return %c0_i32, %c0_i32_0 : i32, i32
  }
  func.func @transform_2(%arg0: i32) -> (i32, i32) {
    %c0_i32 = arith.constant 0 : i32
    %c0_i32_0 = arith.constant 0 : i32
    %c0_i32_1 = arith.constant 0 : i32
    return %c0_i32, %c0_i32_0 : i32, i32
  }
  func.func @transform_3(%arg0: i32) -> (i32, i32, i32) {
    %c0_i32 = arith.constant 0 : i32
    %c0_i32_0 = arith.constant 0 : i32
    %c0_i32_1 = arith.constant 0 : i32
    return %arg0, %c0_i32, %c0_i32_0 : i32, i32, i32
  }
  func.func @transform_4(%arg0: i32) -> (i32, i32, i32) {
    %c0_i32 = arith.constant 0 : i32
    %c0_i32_0 = arith.constant 0 : i32
    %c0_i32_1 = arith.constant 0 : i32
    return %arg0, %c0_i32, %c0_i32_0 : i32, i32, i32
  }
  func.func @transform_5(%arg0: i32) -> (i32, i32, i32) {
    %c0_i32 = arith.constant 0 : i32
    %c0_i32_0 = arith.constant 0 : i32
    %c0_i32_1 = arith.constant 0 : i32
    return %arg0, %c0_i32, %c0_i32_0 : i32, i32, i32
  }
  func.func @transform_6(%arg0: i32) -> (i32, i32) {
    %c0_i32 = arith.constant 0 : i32
    %c0_i32_0 = arith.constant 0 : i32
    %c0_i32_1 = arith.constant 0 : i32
    return %c0_i32, %c0_i32_0 : i32, i32
  }
  func.func @transform_7(%arg0: i32) -> (i32, i32) {
    %c0_i32 = arith.constant 0 : i32
    %c0_i32_0 = arith.constant 0 : i32
    %c0_i32_1 = arith.constant 0 : i32
    return %c0_i32, %c0_i32_0 : i32, i32
  }
  func.func @transform_8(%arg0: i32) -> (i32, i32) {
    %c0_i32 = arith.constant 0 : i32
    %c0_i32_0 = arith.constant 0 : i32
    %c0_i32_1 = arith.constant 0 : i32
    return %c0_i32, %c0_i32_0 : i32, i32
  }
  func.func @transform_9(%arg0: i32) -> (i32, i32) {
    %c0_i32 = arith.constant 0 : i32
    %c0_i32_0 = arith.constant 0 : i32
    %c0_i32_1 = arith.constant 0 : i32
    return %c0_i32, %c0_i32_0 : i32, i32
  }
}

</mosaic_0001>

<bundles_post_ra>
// kernel: tpu_custom_call.1
= control target key start
LH: loop header
LB: loop body
LE: loop exit
PB: predicated region body
PF: predicated region fallthrough
CT: control target
= control target key end

     0   :  { %s2261_s0 = inlined_call_operand.hbm [shape: bf16[16,16], index: 0, kind: input, shape index: {}]   ;;  %s2262_s1 = inlined_call_operand.hbm [shape: f32[16,128], index: 1, kind: input, shape index: {}]   ;;  %s2263_s2 = inlined_call_operand.hbm [shape: f32[8,16], index: 2, kind: input, shape index: {}]   ;;  %s2264_s3 = inlined_call_operand.hbm [shape: bf16[2,128,128], index: 3, kind: input, shape index: {}]   ;;  %s2265_s4 = inlined_call_operand.hbm [shape: bf16[2,128,128], index: 4, kind: input, shape index: {}]   ;;  %s2266_s5 = inlined_call_operand.hbm [shape: f32[2,8,128], index: 5, kind: input, shape index: {}]   ;;  %s2267_s6 = inlined_call_operand.hbm [shape: bf16[128,128], index: 6, kind: input, shape index: {}]   ;;  %s2268_s7 = inlined_call_operand.vmem [shape: f32[1,128], index: 7, kind: input, shape index: {}]   ;;  %s2269_s8 = inlined_call_operand.hbm [shape: f32[16,128], index: 8, kind: output, shape index: {0}]   ;;  %s2270_s9 = inlined_call_operand.hbm [shape: f32[16,128], index: 9, kind: output, shape index: {1}]  }
   0x1   :  { %2286 = sst [smem:[#allocation27_spill]] %s2262_s1 }
   0x2   :  { %2287 = sst [smem:[#allocation28_spill]] %s2264_s3 }
   0x3   :  { %2288 = sst [smem:[#allocation29_spill]] %s2267_s6 }
   0x4   :  { %2289 = sst [smem:[#allocation30_spill]] %s2269_s8 }
   0x5   :  { %2290 = sst [smem:[#allocation31_spill]] %s2270_s9 }
   0x6   :  { %15 = vsyncpa [#allocation4], 0 }
   0x7   :  { %16 = vsyncpa [#allocation7], 0 }
   0x8   :  { %17 = vsyncpa [#allocation10], 0 }
   0x9   :  { %19 = vsyncpa [#allocation10 + $0x1], 0 }
   0xa   :  { %20 = vsyncpa [#allocation13], 0 }
   0xb   :  { %22 = vsyncpa [#allocation13 + $0x1], 0 }
   0xc   :  { %23 = vsyncpa [#allocation5], 0 }
   0xd   :  { %24 = vsyncpa [#allocation17], 0  ;;  %s1907_s30 = smov 0   ;;  %s1909_s10 = smov 0  }
   0xe   :  { %s1911_s11 = smov 0   ;;  %s1913_s12 = smov 0  }
   0xf LB: > { %s1926_s13 = sadd.s32 4294967295, %s1836_s12   ;;  %p113_p0 = scmp.ne.s32.totalorder %s1828_s10, %s1824_s30  ;;  %s1836_s12 = sphi %s1913_s12, %s2320_s12   ;;  %s1832_s11 = sphi %s1911_s11, %s2324_s11   ;;  %s1828_s10 = sphi %s1909_s10, %s2323_s10   ;;  %s1824_s30 = sphi %s1907_s30, %s2322_s30  }
  0x10   : > { %p2278_p1 = scmp.eq.s32.totalorder %s1926_s13, 0  ;;  %p1225_p2 = scmp.ge.s32.totalorder %s1836_s12, 1 }
  0x11   : > { %p260_p3 = scmp.lt.s32.totalorder %s1836_s12, 3  ;;  %s1838_s16 = smov [#allocation6]  }
  0x12   : > { %p1935_p5 = por %p2278_p1, %p113_p0  ;;  %s285_s17 = sshll.u32 %s1838_s16, 4  ;;  %s286_s17 = int_to_ptr.vmem [resolvable:$true] %s285_s17 }
  0x13   : > { %p1939_p6 = pnand %p1225_p2, %p260_p3  ;;  %s1839_s19 = smov [#allocation14]  }
  0x14   : > { %s2291_s14 = scalar_select %p1935_p5, 1, 0 }
  0x15   : > { %s2292_s15 = scalar_select %p1939_p6, 1, 0 }
  0x16   : > { %p1431_p7 = pneg %p1939_p6  ;;  %s309_s20 = sshll.u32 %s1839_s19, 4  ;;  %s310_s20 = int_to_ptr.vmem [resolvable:$true] %s309_s20 }
  0x17   : > { %s1553_s21 = scalar_lea.vmem %s286_s17, 256  ;;  %p1561_p13 = scmp.lt.s32.totalorder %s286_s17, %s286_s17 }
  0x18   : > { %p1947_p8 = pnand %p1431_p7, %p2278_p1  ;;  %p1554_p10 = scmp.ne.s32.totalorder %s286_s17, %s1553_s21 }
  0x19   : > { %p1562_p0 = scmp.lt.s32.totalorder %s1553_s21, %s1553_s21 }
  0x1a   : > { %s2293_s18 = scalar_select %p1947_p8, 1, 0 }
  0x1b   : > { %p2279_p9 = pneg %p1947_p8  ;;  %p1563_p2 = por %p1562_p0, %p1561_p13 }
  0x1d   : > { %p1556_p11 = pnand %p1554_p10, %p2279_p9 }
  0x1f   : > { %p1557_p12 = pneg %p1556_p11 }
  0x21   : > { %p1564_p3 = pnand %p1563_p2, %p1557_p12 }
  0x23   : > { %1567 = shalt.err (!%p1564_p3)
}
  0x24   : > { %s1840_s22 = smov 128   ;;  %s1841_s23 = smov 8  }
  0x25   : > { %s2294_s1 = sld [smem:[#allocation27_spill]]  ;;  %s1579_s26 = scalar_lea.vmem %s310_s20, 1024 }
  0x26   : > { %p1580_p7 = scmp.ne.s32.totalorder %s310_s20, %s1579_s26  ;;  %p1587_p4 = scmp.lt.s32.totalorder %s310_s20, %s310_s20 }
  0x27   : > { %p1588_p13 = scmp.lt.s32.totalorder %s1579_s26, %s1579_s26 }
  0x28   : > { %p1582_p10 = pnand %p1580_p7, %p2279_p9 }
  0x29   : > { %p1589_p12 = por %p1588_p13, %p1587_p4 }
  0x2a   : > { %p1583_p11 = pneg %p1582_p10 }
  0x2b   : > { %1437 = dma.hbm_to_vmem [thread:$0]  (!%p1947_p8), %s2294_s1, 256, %s286_s17, [#allocation7], %s1840_s22, %s1840_s22, %s1841_s23  }
  0x2c   : > { %p1590_p0 = pnand %p1589_p12, %p1583_p11 }
  0x2e   : > { %1593 = shalt.err (!%p1590_p0)
}
  0x2f   : > { %s2272_s27 = smov 64   ;;  %s2275_s28 = smov 4  }
  0x30   : > { %s2295_s6 = sld [smem:[#allocation29_spill]]  ;;  %s1973_s16 = sadd.s32 1, %s1836_s12  }
  0x31   : > { %2296 = sst [smem:[#allocation25_spill]] %s1973_s16  ;;  %s100_s17 = sadd.s32 1, %s1832_s11 }
  0x32   : > { %s97_s19 = ssub.s32 %s1836_s12, %s1973_s16  ;;  %p107_p4 = scmp.ne.s32.totalorder %s1832_s11, %s1828_s10 }
  0x33   : > { %p98_p2 = scmp.eq.s32.totalorder %s97_s19, 0  ;;  %p108_p3 = scmp.eq.s32.totalorder %s1836_s12, 0 }
  0x34   : > { %p1458_p7 = scmp.lt.s32.totalorder %s1836_s12, 2  ;;  %s2277_s21 = sand.u32 1, %s1836_s12  }
  0x35   : > { %s1984_s22 = scalar_select %p98_p2, %s1832_s11, %s100_s17  }
  0x36   : > { %1443 = dma.hbm_to_vmem [thread:$0]  (!%p1947_p8), %s2295_s6, 1024, %s310_s20, [#allocation13], %s2272_s27, %s2272_s27, %s2275_s28  }
  0x37   : > { %2297 = sst [smem:[#allocation26_spill]] %s1984_s22  ;;  %p109_p10 = por %p108_p3, %p107_p4 }
  0x38   : > { %s2271_s23 = sand.u32 1, %s1832_s11   ;;  %s2274_s24 = sshll.u32 %s1836_s12, 10 }
  0x39   : > { %s1990_s25 = sshll.u32 %s2271_s23, 6  ;;  %s2298_s3 = sld [smem:[#allocation28_spill]] }
  0x3a   : > { %p1999_p11 = pnand %p1458_p7, %p109_p10  ;;  %s330_s17 = scalar_lea.vmem [#allocation9], %s1990_s25 }
  0x3b   : > { %s337_s19 = sshll.u32 %s330_s17, 4  ;;  %s2008_s23 = scalar_lea.sflag [#allocation10], %s2277_s21  ;;  %s2004_s19 = int_to_ptr.vmem [resolvable:$true] %s337_s19 }
  0x3c   : > { %p2014_p12 = pneg %p1999_p11 }
  0x3f   : > { %s1997_s29 = scalar_lea.hbm %s2298_s3, %s2274_s24  ;;  %s1599_s17 = scalar_lea.hbm %s2298_s3, 2048 }
  0x40   : > { %s1594_s27 = scalar_lea.hbm %s1997_s29, 1024  ;;  %p1600_p2 = scmp.lt.s32.totalorder %s1997_s29, %s2298_s3 }
  0x41   : > { %p1595_p13 = scmp.ne.s32.totalorder %s1997_s29, %s1594_s27  ;;  %p1601_p3 = scmp.lt.s32.totalorder %s1599_s17, %s1594_s27 }
  0x43   : > { %p1597_p0 = pnand %p2014_p12, %p1595_p13  ;;  %p1602_p7 = por %p1601_p3, %p1600_p2 }
  0x45   : > { %p1598_p4 = pneg %p1597_p0 }
  0x47   : > { %p1603_p10 = pnand %p1602_p7, %p1598_p4 }
  0x49   : > { %1606 = shalt.err (!%p1603_p10)
}
  0x4a   : > { %s1607_s21 = scalar_lea.vmem %s2004_s19, 1024  ;;  %s1844_s6 = smov [#allocation9]  }
  0x4b   : > { %p1608_p1 = scmp.ne.s32.totalorder %s2004_s19, %s1607_s21  ;;  %s1612_s24 = sshll.u32 %s1844_s6, 4  ;;  %s1613_s24 = int_to_ptr.vmem [resolvable:$false] %s1612_s24 }
  0x4c   : > { %s1614_s26 = scalar_lea.vmem %s1613_s24, 2048  ;;  %p1615_p9 = scmp.lt.s32.totalorder %s2004_s19, %s1613_s24 }
  0x4d   : > { %p1610_p13 = pnand %p1608_p1, %p2014_p12  ;;  %p1616_p5 = scmp.lt.s32.totalorder %s1614_s26, %s1607_s21 }
  0x4f   : > { %p1611_p0 = pneg %p1610_p13  ;;  %p1617_p6 = por %p1616_p5, %p1615_p9 }
  0x51   : > { %p1618_p8 = pnand %p1617_p6, %p1611_p0 }
  0x53   : > { %1621 = shalt.err (!%p1618_p8)
}
  0x54   : > { %s2301_s1 = smov 4   ;;  %s2302_s27 = smov 64  }
  0x55   : > { %1447 = dma.hbm_to_vmem [thread:$0]  (!%p1999_p11), %s1997_s29, 1024, %s2004_s19, %s2008_s23, %s2302_s27, %s2302_s27, %s2301_s1  }
  0x56   : > { %s2303_s6 = sshll.u32 %s1836_s12, 10  ;;  %s351_s24 = scalar_lea.vmem [#allocation11], %s1990_s25 }
  0x57   : > { %s2045_s21 = scalar_lea.hbm %s2265_s4, %s2303_s6  ;;  %s358_s26 = sshll.u32 %s351_s24, 4  ;;  %s2048_s26 = int_to_ptr.vmem [resolvable:$true] %s358_s26 }
  0x58   : > { %s1845_s3 = smov [#allocation3]   ;;  %s1846_s16 = smov [#allocation8]  }
  0x59   : > { %s272_s22 = sshll.u32 %s1845_s3, 4  ;;  %s299_s9 = sshll.u32 %s1846_s16, 4  ;;  %s273_s22 = int_to_ptr.vmem [resolvable:$true] %s272_s22  ;;  %s300_s9 = int_to_ptr.vmem [resolvable:$true] %s299_s9 }
  0x5a   : > { %s1633_s8 = scalar_lea.vmem %s273_s22, 128  ;;  %p2304_p5 = scmp.ne.s32.totalorder %s2293_s18, 0 }
  0x5b   : > { %p1634_p1 = scmp.ne.s32.totalorder %s273_s22, %s1633_s8  ;;  %p1641_p4 = scmp.lt.s32.totalorder %s273_s22, %s273_s22 }
  0x5c   : > { %p2305_p6 = pneg %p2304_p5  ;;  %p1642_p2 = scmp.lt.s32.totalorder %s1633_s8, %s1633_s8 }
  0x5e   : > { %p1636_p8 = pnand %p1634_p1, %p2305_p6  ;;  %p1643_p3 = por %p1642_p2, %p1641_p4 }
  0x60   : > { %p1637_p9 = pneg %p1636_p8 }
  0x62   : > { %p1644_p7 = pnand %p1643_p3, %p1637_p9 }
  0x64   : > { %1647 = shalt.err (!%p1644_p7)
}
  0x65   : > { %1434 = dma.hbm_to_vmem [thread:$0]  (!%p2304_p5), %s2261_s0, 128, %s273_s22, [#allocation4], %s2302_s27, %s2302_s27, %s2301_s1  }
  0x66   : > { %s1659_s16 = scalar_lea.vmem %s300_s9, 128  ;;  %p2306_p13 = pmov %p2305_p6 }
  0x67   : > { %p1660_p10 = scmp.ne.s32.totalorder %s300_s9, %s1659_s16  ;;  %p1667_p6 = scmp.lt.s32.totalorder %s300_s9, %s300_s9 }
  0x68   : > { %p1668_p8 = scmp.lt.s32.totalorder %s1659_s16, %s1659_s16 }
  0x69   : > { %p1662_p0 = pnand %p1660_p10, %p2306_p13 }
  0x6a   : > { %p1669_p9 = por %p1668_p8, %p1667_p6 }
  0x6b   : > { %p1663_p1 = pneg %p1662_p0 }
  0x6d   : > { %p1670_p4 = pnand %p1669_p9, %p1663_p1 }
  0x6f   : > { %1673 = shalt.err (!%p1670_p4)
}
  0x70   : > { %1440 = dma.hbm_to_vmem [thread:$0]  (!%p2304_p5), %s2263_s2, 128, %s300_s9, [#allocation7]  }
  0x71   : > { %s1674_s22 = scalar_lea.hbm %s2045_s21, 1024  ;;  %s1679_s28 = scalar_lea.hbm %s2265_s4, 2048 }
  0x72   : > { %p1675_p2 = scmp.ne.s32.totalorder %s2045_s21, %s1674_s22  ;;  %p1680_p10 = scmp.lt.s32.totalorder %s2045_s21, %s2265_s4 }
  0x73   : > { %p1681_p13 = scmp.lt.s32.totalorder %s1679_s28, %s1674_s22 }
  0x74   : > { %p1677_p3 = pnand %p1675_p2, %p2014_p12 }
  0x75   : > { %p1682_p0 = por %p1681_p13, %p1680_p10 }
  0x76   : > { %p1678_p7 = pneg %p1677_p3 }
  0x78   : > { %p1683_p1 = pnand %p1682_p0, %p1678_p7 }
  0x7a   : > { %1686 = shalt.err (!%p1683_p1)
}
  0x7b   : > { %s1687_s9 = scalar_lea.vmem %s2048_s26, 1024  ;;  %s1847_s18 = smov [#allocation11]  }
  0x7c   : > { %p1688_p5 = scmp.ne.s32.totalorder %s2048_s26, %s1687_s9  ;;  %s1692_s3 = sshll.u32 %s1847_s18, 4  ;;  %s1693_s3 = int_to_ptr.vmem [resolvable:$false] %s1692_s3 }
  0x7d   : > { %s1694_s25 = scalar_lea.vmem %s1693_s3, 2048  ;;  %p1695_p9 = scmp.lt.s32.totalorder %s2048_s26, %s1693_s3 }
  0x7e   : > { %p1690_p6 = pnand %p1688_p5, %p2014_p12  ;;  %p1696_p4 = scmp.lt.s32.totalorder %s1694_s25, %s1687_s9 }
  0x80   : > { %p1691_p8 = pneg %p1690_p6  ;;  %p1697_p2 = por %p1696_p4, %p1695_p9 }
  0x82   : > { %p1698_p3 = pnand %p1697_p2, %p1691_p8 }
  0x84   : > { %1701 = shalt.err (!%p1698_p3)
}
  0x85   : > { %1450 = dma.hbm_to_vmem [thread:$0]  (!%p1999_p11), %s2045_s21, 1024, %s2048_s26, %s2008_s23, %s2302_s27, %s2302_s27, %s2301_s1  }
  0x86   : > { %s2307_s16 = sand.u32 1, %s1832_s11   ;;  %s1238_s29 = sshll.u32 %s1836_s12, 7 }
  0x87   : > { %s1237_s8 = sshll.u32 %s2307_s16, 3  ;;  %s2099_s6 = scalar_lea.hbm %s2266_s5, %s1238_s29 }
  0x88   : > { %s372_s28 = scalar_lea.vmem [#allocation12], %s1237_s8  ;;  %s2308_s24 = sand.u32 1, %s1836_s12  }
  0x89   : > { %s379_s17 = sshll.u32 %s372_s28, 4  ;;  %s369_s9 = scalar_lea.sflag [#allocation13], %s2308_s24  ;;  %s380_s17 = int_to_ptr.vmem [resolvable:$true] %s379_s17 }
  0x8a   : > { %s1702_s18 = scalar_lea.hbm %s2099_s6, 128  ;;  %s1707_s27 = scalar_lea.hbm %s2266_s5, 256 }
  0x8b   : > { %p1703_p7 = scmp.ne.s32.totalorder %s2099_s6, %s1702_s18  ;;  %p1708_p0 = scmp.lt.s32.totalorder %s2099_s6, %s2266_s5 }
  0x8c   : > { %p1709_p1 = scmp.lt.s32.totalorder %s1707_s27, %s1702_s18 }
  0x8d   : > { %p1705_p10 = pnand %p1703_p7, %p2014_p12 }
  0x8e   : > { %p1710_p5 = por %p1709_p1, %p1708_p0 }
  0x8f   : > { %p1706_p13 = pneg %p1705_p10 }
  0x91   : > { %p1711_p6 = pnand %p1710_p5, %p1706_p13 }
  0x93   : > { %1714 = shalt.err (!%p1711_p6)
}
  0x94   : > { %s1715_s3 = scalar_lea.vmem %s380_s17, 128  ;;  %s1848_s12 = smov [#allocation12]  }
  0x95   : > { %p1716_p8 = scmp.ne.s32.totalorder %s380_s17, %s1715_s3  ;;  %s1720_s25 = sshll.u32 %s1848_s12, 4  ;;  %s1721_s25 = int_to_ptr.vmem [resolvable:$false] %s1720_s25 }
  0x96   : > { %s1722_s16 = scalar_lea.vmem %s1721_s25, 256  ;;  %p1723_p2 = scmp.lt.s32.totalorder %s380_s17, %s1721_s25 }
  0x97   : > { %p1718_p9 = pnand %p1716_p8, %p2014_p12  ;;  %p1724_p3 = scmp.lt.s32.totalorder %s1722_s16, %s1715_s3 }
  0x99   : > { %p1719_p4 = pneg %p1718_p9  ;;  %p1725_p7 = por %p1724_p3, %p1723_p2 }
  0x9b   : > { %p1726_p10 = pnand %p1725_p7, %p1719_p4 }
  0x9d   : > { %1729 = shalt.err (!%p1726_p10)
}
  0x9e   : > { %1453 = dma.hbm_to_vmem [thread:$0]  (!%p1999_p11), %s2099_s6, 128, %s380_s17, %s369_s9  }
  0x9f   : > { %p2309_p13 = scmp.ne.s32.totalorder %s2292_s15, 0 }
  0xa0   : > { %p2310_p0 = scmp.eq.s32.totalorder (!%p2309_p13), %s1926_s13, 0 }
  0xa1   : > { %388 = sbr.rel (%p2309_p13) target bundleno = 1525 (0x5f5), region = 52 }
  0xa6   : > { %1795 = dma.done.wait (%p2310_p0), [#allocation4], 128   ;;  %p2311_p12 = pmov %p2310_p0 }
  0xa7   : > { %p2312_p1 = pmov %p2310_p0 }
  0xa8   : > { %1797 = vsyncadd (%p2311_p12), [#allocation4], 4294967168 }
  0xa9   : > { %1799 = dma.done.wait (%p2312_p1), [#allocation7], 384   ;;  %p2313_p5 = pmov %p2310_p0 }
  0xaa   : > { %s402_s30 = sand.u32 1, %s1926_s13   ;;  %s404_s20 = sand.u32 1, %s1828_s10  }
  0xab   : > { %1801 = vsyncadd (%p2313_p5), [#allocation7], 4294966912  ;;  %s1243_s8 = sshll.u32 %s404_s20, 6  ;;  %s403_s15 = scalar_lea.sflag [#allocation10], %s402_s30 }
  0xac   : > { %s2131_s29 = scalar_lea.vmem [#allocation9], %s1243_s8  ;;  %p2314_p11 = scmp.ne.s32.totalorder %s2291_s14, 0 }
  0xae   : > { %1803 = dma.done.wait (%p2314_p11), %s403_s15, 2048  }
  0xaf   : > { %1805 = vsyncadd (%p2314_p11), %s403_s15, 4294965248  ;;  %s2137_s22 = sshll.u32 %s404_s20, 3  ;;  %s2139_s19 = scalar_lea.vmem [#allocation11], %s1243_s8 }
  0xb0   : > { %s421_s6 = scalar_lea.sflag [#allocation13], %s402_s30  ;;  %s424_s28 = scalar_lea.vmem [#allocation12], %s2137_s22 }
  0xb1   : > { %1807 = dma.done.wait (%p2314_p11), %s421_s6, 128  }
  0xb2   : > { %1809 = vsyncadd (%p2314_p11), %s421_s6, 4294967168  ;;  %p2315_p6 = pmov %p2310_p0 }
  0xb3   : > { %p2316_p8 = pmov %p2310_p0 }
  0xb4   : > { %1811 = dma.done.wait (%p2315_p6), [#allocation13], 1024  }
  0xb5   : > { %1813 = vsyncadd (%p2316_p8), [#allocation13], 4294966272  ;;  %p2317_p9 = scmp.ne.s32.totalorder %s1926_s13, 0 }
  0xb7   : > { %472 = sbr.rel (%p2317_p9) target bundleno = 190 (0xbe), region = 84 }
  0xbc   : > { %v473_v0 = vld [vmem:[#allocation6] sm:$0xff]  ;;  %v474_v1 = vld [vmem:[#allocation6 + $0x8] sm:$0xff] }
  0xbd   : > { %475 = vst [vmem:[#allocation2] sm:$0xff] %v473_v0  ;;  %476 = vst [vmem:[#allocation2 + $0x8] sm:$0xff] %v474_v1 }
  0xbe PF: > { %v1515_v2 = vld [vmem:[%s2131_s29 + $0x38] sm:$0xff]   ;;  %v1849_v3 = vmov 0.0   ;;  %v1516_v4 = vld [vmem:[%s2131_s29 + $0x30] sm:$0xff]   ;;  %vm1850_vm0 = vmmov 0   ;;  %v1517_v5 = vld [vmem:[%s2131_s29 + $0x28] sm:$0xff]   ;;  %vm611_vm1 = vcmask 130048   ;;  %v658_v20 = vlaneseq }
  0xbf   : > { %1321 = vmatprep.subr.bf16.mxu0 %v1849_v3  ;;  %1347 = vmatprep.subr.mxu1 %v1849_v3  ;;  %v1518_v6 = vld [vmem:[%s2131_s29 + $0x20] sm:$0xff]   ;;  %v1519_v7 = vld [vmem:[%s2131_s29 + $0x18] sm:$0xff]   ;;  %v1520_v8 = vld [vmem:[%s2131_s29 + $0x10] sm:$0xff]   ;;  %p1268_p4 = scmp.ne.s32.totalorder %s1926_s13, 1 }
  0xc0   : > { %1322 = vmatpush3.bf16.msra.mxu0 %v1515_v2  ;;  %1337 = vmatprep.mubr.msk.bf16.mxu0 %vm1850_vm0, %v1849_v3  ;;  %v1521_v9 = vld [vmem:[%s2131_s29 + $0x8] sm:$0xff]   ;;  %v1522_v10 = vld [vmem:[%s2131_s29] sm:$0xff]   ;;  %v2177_v21 = vshrl.u32 %v658_v20, 7  ;;  %v481_v33 = vld [vmem:[#allocation8] sm:$0xff] }
  0xc1   : > { %1323 = vmatprep.subr.bf16.mxu0 %v1849_v3  ;;  %1351 = vmatprep.mubr.msk.f32.mxu1 %vm1850_vm0, %v1849_v3  ;;  %v1523_v19 = vld [vmem:[#allocation3] sm:$0xff]   ;;  %v1524_v42 = vld [vmem:[%s2139_s19 + $0x38] sm:$0xff]   ;;  %v1525_v43 = vld [vmem:[%s2139_s19 + $0x30] sm:$0xff]  }
  0xc2   : > { %v2180_v23 = vsub.s32 0, %v2177_v21  ;;  %v2184_v24 = vld [vmem:[%s424_s28] sm:$0xff]  ;;  %v1528_v46 = vld [vmem:[%s2139_s19 + $0x18] sm:$0xff]   ;;  %v1529_v47 = vld [vmem:[%s2139_s19 + $0x10] sm:$0xff]   ;;  %v819_v54 = vsub.s32 1, %v2177_v21  ;;  %v833_v56 = vsub.s32 2, %v2177_v21 }
  0xc3   : > { %v1526_v44 = vld [vmem:[%s2139_s19 + $0x28] sm:$0xff]   ;;  %v1527_v45 = vld [vmem:[%s2139_s19 + $0x20] sm:$0xff]  }
  0xc4   : > { %1324 = vmatpush3.bf16.msra.mxu0 %v1516_v4  ;;  %v479_v11 = vld [vmem:[#allocation2] sm:$0xff]  ;;  %v480_v12 = vld [vmem:[#allocation2 + $0x8] sm:$0xff]  ;;  %v661_v28 = vrot.slane %v2184_v24, %v2180_v23  ;;  %v1530_v48 = vld [vmem:[%s2139_s19 + $0x8] sm:$0xff]   ;;  %v820_v55 = vrot.slane %v2184_v24, %v819_v54  ;;  %v834_v61 = vrot.slane %v2184_v24, %v833_v56 }
  0xc5   : > { %1325 = vmatprep.subr.bf16.mxu0 %v1849_v3  ;;  %v515_v13 = vpack.c.bf16 %v480_v12, %v479_v11  ;;  %v1531_v49 = vld [vmem:[%s2139_s19] sm:$0xff]  }
  0xc8   : > { %1326 = vmatpush3.bf16.msra.mxu0 %v1517_v5  ;;  %v842_v5 = vsub.s32 3, %v2177_v21 }
  0xc9   : > { %1327 = vmatprep.subr.bf16.mxu0 %v1849_v3 }
  0xcc   : > { %1328 = vmatpush3.bf16.msra.mxu0 %v1518_v6  ;;  %v843_v6 = vrot.slane %v2184_v24, %v842_v5 }
  0xcd   : > { %1329 = vmatprep.subr.bf16.mxu0 %v1849_v3 }
  0xd0   : > { %1330 = vmatpush3.bf16.msra.mxu0 %v1519_v7 }
  0xd1   : > { %1331 = vmatprep.subr.bf16.mxu0 %v1849_v3 }
  0xd4   : > { %1332 = vmatpush3.bf16.msra.mxu0 %v1520_v8 }
  0xd5   : > { %1333 = vmatprep.subr.bf16.mxu0 %v1849_v3 }
  0xd8   : > { %1334 = vmatpush3.bf16.msra.mxu0 %v1521_v9 }
  0xd9   : > { %1335 = vmatprep.subr.bf16.mxu0 %v1849_v3 }
  0xdc   : > { %1336 = vmatpush3.bf16.msra.mxu0 %v1522_v10 }
  0xdd   : > { %1341 = vmatprep.subr.bf16.mxu0 %v1849_v3 }
  0xdf   : > { %1338 = vmatmul.mubr.bf16.vlgmr.msra.gmra.mxu0 %v515_v13 }
  0xe0   : > { %1343 = vmatprep.mubr.msk.bf16.mxu0 %vm1850_vm0, %v1849_v3 }
 0x19f   : > { %v598_v14 = vpop.f32.mrf.mxu0 }
 0x1a1   : > { %v1339_v15 = vpop.f32.mrf.mxu0 }
 0x1a3   : > { %v601_v16 = vpop.f32.mrf.mxu0 }
 0x1a4   : > { %v605_v17 = vpack.c.bf16 %v601_v16, %v598_v14 }
 0x1a5   : > { %v1340_v18 = vpop.f32.mrf.mxu0 }
 0x1a6   : > { %1342 = vmatpush3.bf16.msra.mxu0 %v605_v17 }
 0x1a9   : > { %1344 = vmatmul.mubr.msk.bf16.vlgmr.msra.gmra.mxu0 %vm611_vm1, %v1523_v19 }
 0x269   : > { %v649_v22 = vpop.f32.mrf.mxu0 }
 0x26a   : > { %v656_v27 = vadd.f32 %v649_v22, %v598_v14 }
 0x26b   : > { %v1345_v25 = vpop.f32.mrf.mxu0 }
 0x26c   : > { %v662_v32 = vadd.f32 %v661_v28, %v656_v27 }
 0x26d   : > { %v652_v26 = vpop.f32.mrf.mxu0 }
 0x26e   : > { %v657_v29 = vadd.f32 %v652_v26, %v601_v16 }
 0x26f   : > { %v1346_v30 = vpop.f32.mrf.mxu0 }
 0x270   : > { %v663_v31 = vadd.f32 %v661_v28, %v657_v29 }
 0x272   : > { %1348 = vmatpush3.msra.mxu1 %v663_v31 }
 0x273   : > { %1349 = vmatprep.subr.mxu1 %v1849_v3 }
 0x274   : > { %1350 = vmatpush3.msra.mxu1 %v662_v32 }
 0x275   : > { %1352 = vmatmul.mubr.msk.f32.vlgmr.msra.gmra.mxu1 %vm611_vm1, %v481_v33  ;;  %1354 = vmatprep.subr.mxu1 %v1849_v3 }
 0x276   : > { %1358 = vmatprep.mubr.msk.f32.mxu1 %vm1850_vm0, %v1849_v3 }
 0x335   : > { %v733_v34 = vpop.f32.mrf.mxu1 }
 0x336   : > { %v737_v35 = vmul.f32 0.0625, %v733_v34 }
 0x337   : > { %v1353_v36 = vpop.f32.mrf.mxu1 }
 0x338   : > { %v741_v37 = vrot.slane %v737_v35, %v2180_v23 }
 0x33a   : > { %v742_v38 = vsub.f32 %v662_v32, %v741_v37  ;;  %v743_v39 = vsub.f32 %v663_v31, %v741_v37 }
 0x33c   : > { %v745_v40 = vmul.f32 %v743_v39, %v743_v39  ;;  %v744_v41 = vmul.f32 %v742_v38, %v742_v38  ;;  %v821_v58 = vmul.f32 %v820_v55, %v742_v38  ;;  %v822_v59 = vmul.f32 %v820_v55, %v743_v39 }
 0x33e   : > { %1355 = vmatpush3.msra.mxu1 %v745_v40 }
 0x33f   : > { %1356 = vmatprep.subr.mxu1 %v1849_v3 }
 0x340   : > { %1357 = vmatpush3.msra.mxu1 %v744_v41 }
 0x341   : > { %1359 = vmatmul.mubr.msk.f32.vlgmr.msra.gmra.mxu1 %vm611_vm1, %v481_v33  ;;  %1361 = vmatprep.subr.bf16.mxu1 %v1849_v3 }
 0x342   : > { %1362 = vmatpush3.bf16.msra.mxu1 %v1524_v42  ;;  %1377 = vmatprep.mubr.msk.bf16.mxu1 %vm1850_vm0, %v1849_v3 }
 0x343   : > { %1363 = vmatprep.subr.bf16.mxu1 %v1849_v3 }
 0x346   : > { %1364 = vmatpush3.bf16.msra.mxu1 %v1525_v43 }
 0x347   : > { %1365 = vmatprep.subr.bf16.mxu1 %v1849_v3 }
 0x34a   : > { %1366 = vmatpush3.bf16.msra.mxu1 %v1526_v44 }
 0x34b   : > { %1367 = vmatprep.subr.bf16.mxu1 %v1849_v3 }
 0x34e   : > { %1368 = vmatpush3.bf16.msra.mxu1 %v1527_v45 }
 0x34f   : > { %1369 = vmatprep.subr.bf16.mxu1 %v1849_v3 }
 0x352   : > { %1370 = vmatpush3.bf16.msra.mxu1 %v1528_v46 }
 0x353   : > { %1371 = vmatprep.subr.bf16.mxu1 %v1849_v3 }
 0x356   : > { %1372 = vmatpush3.bf16.msra.mxu1 %v1529_v47 }
 0x357   : > { %1373 = vmatprep.subr.bf16.mxu1 %v1849_v3 }
 0x35a   : > { %1374 = vmatpush3.bf16.msra.mxu1 %v1530_v48 }
 0x35b   : > { %1375 = vmatprep.subr.bf16.mxu1 %v1849_v3 }
 0x35e   : > { %1376 = vmatpush3.bf16.msra.mxu1 %v1531_v49 }
 0x401   : > { %v812_v50 = vpop.f32.mrf.mxu1 }
 0x402   : > { %v816_v51 = vmul.f32 0.0625, %v812_v50 }
 0x403   : > { %v1360_v52 = vpop.f32.mrf.mxu1 }
 0x404   : > { %v823_v53 = vadd.f32 1e-05, %v816_v51 }
 0x406   : > { %1532 = vrsqrt.f32 %v823_v53 }
 0x413   : > { %v1533_v57 = vpop.eup %1532 }
 0x414   : > { %v828_v60 = vrot.slane %v1533_v57, %v2180_v23 }
 0x416   : > { %v829_v62 = vmul.f32 %v828_v60, %v821_v58  ;;  %v830_v63 = vmul.f32 %v828_v60, %v822_v59 }
 0x418   : > { %v835_v0 = vadd.f32 %v834_v61, %v829_v62  ;;  %v836_v1 = vadd.f32 %v834_v61, %v830_v63 }
 0x41a   : > { %v837_v2 = vmax.f32 %v835_v0, 0.0  ;;  %v838_v3 = vmax.f32 %v836_v1, 0.0 }
 0x41c   : > { %v839_v4 = vpack.c.bf16 %v838_v3, %v837_v2 }
 0x41e   : > { %1378 = vmatmul.mubr.bf16.vlgmr.msra.gmra.mxu1 %v839_v4 }
 0x4de   : > { %v926_v7 = vpop.f32.mrf.mxu1 }
 0x4df   : > { %v927_v8 = vadd.f32 %v926_v7, %v843_v6 }
 0x4e0   : > { %v1379_v9 = vpop.f32.mrf.mxu1 }
 0x4e1   : > { %v933_v10 = vmax.f32 %v927_v8, 0.0 }
 0x4e2   : > { %v929_v11 = vpop.f32.mrf.mxu1 }
 0x4e3   : > { %935 = vst [vmem:[#allocation2] sm:$0xff] %v933_v10  ;;  %v930_v12 = vadd.f32 %v929_v11, %v843_v6  ;;  %940 = sbr.rel (%p1268_p4) target bundleno = 1489 (0x5d1), region = 88 }
 0x4e4   : > { %v1380_v13 = vpop.f32.mrf.mxu1 }
 0x4e5   : > { %v934_v14 = vmax.f32 %v930_v12, 0.0 }
 0x4e7   : > { %936 = vst [vmem:[#allocation2 + $0x8] sm:$0xff] %v934_v14 }
 0x4e8   : > { %941 = vst [vmem:[#allocation15] sm:$0xff] %v933_v10  ;;  %942 = vst [vmem:[#allocation15 + $0x8] sm:$0xff] %v934_v14  ;;  %v1534_v15 = vld [vmem:[#allocation14 + $0x38] sm:$0xff]   ;;  %v1851_v16 = vmov 0.0   ;;  %v1535_v17 = vld [vmem:[#allocation14 + $0x30] sm:$0xff]   ;;  %vm1852_vm2 = vmmov 0   ;;  %v943_v24 = vpack.c.bf16 %v934_v14, %v933_v10 }
 0x4e9   : > { %1381 = vmatprep.subr.bf16.mxu0 %v1851_v16  ;;  %1397 = vmatprep.mubr.msk.bf16.mxu0 %vm1852_vm2, %v1851_v16  ;;  %v1536_v18 = vld [vmem:[#allocation14 + $0x28] sm:$0xff]   ;;  %v1537_v19 = vld [vmem:[#allocation14 + $0x20] sm:$0xff]   ;;  %v1538_v20 = vld [vmem:[#allocation14 + $0x18] sm:$0xff]  }
 0x4ea   : > { %1382 = vmatpush3.bf16.msra.mxu0 %v1534_v15  ;;  %v1539_v21 = vld [vmem:[#allocation14 + $0x10] sm:$0xff]   ;;  %v1540_v22 = vld [vmem:[#allocation14 + $0x8] sm:$0xff]   ;;  %v1541_v23 = vld [vmem:[#allocation14] sm:$0xff]  }
 0x4eb   : > { %1383 = vmatprep.subr.bf16.mxu0 %v1851_v16  ;;  %v1269_v25 = vld [vmem:[%s2268_s7] ss:$0 sm:$0xff] }
 0x4ee   : > { %1384 = vmatpush3.bf16.msra.mxu0 %v1535_v17 }
 0x4ef   : > { %1385 = vmatprep.subr.bf16.mxu0 %v1851_v16 }
 0x4f2   : > { %1386 = vmatpush3.bf16.msra.mxu0 %v1536_v18 }
 0x4f3   : > { %1387 = vmatprep.subr.bf16.mxu0 %v1851_v16 }
 0x4f6   : > { %1388 = vmatpush3.bf16.msra.mxu0 %v1537_v19 }
 0x4f7   : > { %1389 = vmatprep.subr.bf16.mxu0 %v1851_v16 }
 0x4fa   : > { %1390 = vmatpush3.bf16.msra.mxu0 %v1538_v20 }
 0x4fb   : > { %1391 = vmatprep.subr.bf16.mxu0 %v1851_v16 }
 0x4fe   : > { %1392 = vmatpush3.bf16.msra.mxu0 %v1539_v21 }
 0x4ff   : > { %1393 = vmatprep.subr.bf16.mxu0 %v1851_v16 }
 0x502   : > { %1394 = vmatpush3.bf16.msra.mxu0 %v1540_v22 }
 0x503   : > { %1395 = vmatprep.subr.bf16.mxu0 %v1851_v16 }
 0x506   : > { %1396 = vmatpush3.bf16.msra.mxu0 %v1541_v23 }
 0x509   : > { %1398 = vmatmul.mubr.bf16.vlgmr.msra.gmra.mxu0 %v943_v24 }
 0x5c9   : > { %v1049_v26 = vpop.f32.mrf.mxu0 }
 0x5ca   : > { %v1050_v27 = vadd.f32 %v1269_v25, %v1049_v26 }
 0x5cb   : > { %v1399_v28 = vpop.f32.mrf.mxu0 }
 0x5cc   : > { %1056 = vst [vmem:[#allocation16] sm:$0xff] %v1050_v27 }
 0x5cd   : > { %v1052_v29 = vpop.f32.mrf.mxu0 }
 0x5ce   : > { %v1053_v30 = vadd.f32 %v1269_v25, %v1052_v29 }
 0x5cf   : > { %v1400_v31 = vpop.f32.mrf.mxu0 }
 0x5d0   : > { %1057 = vst [vmem:[#allocation16 + $0x8] sm:$0xff] %v1053_v30 }
 0x5d1 PF: > { %p1463_p2 = scmp.eq.s32.totalorder %s1926_s13, 1  ;;  %s1853_s24 = smov [#allocation15]  }
 0x5d2   : > { %s1064_s9 = sshll.u32 %s1853_s24, 4  ;;  %s1065_s9 = int_to_ptr.vmem [resolvable:$true] %s1064_s9 }
 0x5d3   : > { %s1730_s18 = scalar_lea.vmem %s1065_s9, 256  ;;  %p1737_p13 = scmp.lt.s32.totalorder %s1065_s9, %s1065_s9 }
 0x5d4   : > { %p1731_p3 = scmp.ne.s32.totalorder %s1065_s9, %s1730_s18  ;;  %p1738_p0 = scmp.lt.s32.totalorder %s1730_s18, %s1730_s18 }
 0x5d6   : > { %p1732_p7 = pnand %p1731_p3, %p1463_p2  ;;  %p1739_p12 = por %p1738_p0, %p1737_p13 }
 0x5d8   : > { %p1733_p10 = pneg %p1732_p7 }
 0x5da   : > { %p1740_p1 = pnand %p1739_p12, %p1733_p10 }
 0x5dc   : > { %1743 = shalt.err (!%p1740_p1)
}
 0x5dd   : > { %s1854_s23 = smov 128   ;;  %s1855_s1 = smov 8  }
 0x5de   : > { %s2318_s26 = sld [smem:[#allocation30_spill]]  ;;  %s1856_s3 = smov [#allocation16]  }
 0x5df   : > { %s1077_s12 = sshll.u32 %s1856_s3, 4  ;;  %s1078_s12 = int_to_ptr.vmem [resolvable:$true] %s1077_s12 }
 0x5e0   : > { %s1754_s25 = scalar_lea.vmem %s1078_s12, 256  ;;  %p1761_p8 = scmp.lt.s32.totalorder %s1078_s12, %s1078_s12 }
 0x5e1   : > { %p1755_p5 = scmp.ne.s32.totalorder %s1078_s12, %s1754_s25  ;;  %p1762_p9 = scmp.lt.s32.totalorder %s1754_s25, %s1754_s25 }
 0x5e3   : > { %p1756_p11 = pnand %p1755_p5, %p1463_p2  ;;  %p1763_p4 = por %p1762_p9, %p1761_p8 }
 0x5e4   : > { %1424 = dma.vmem_to_hbm [thread:$0]  (%p1463_p2), %s1065_s9, 256, %s2318_s26, [#allocation5], %s1854_s23, %s1854_s23, %s1855_s1  }
 0x5e5   : > { %p1757_p6 = pneg %p1756_p11 }
 0x5e7   : > { %p1764_p3 = pnand %p1763_p4, %p1757_p6 }
 0x5e9   : > { %1767 = shalt.err (!%p1764_p3)
}
 0x5ea   : > { %s2319_s20 = sld [smem:[#allocation31_spill]] }
 0x5f0   : > { %1426 = dma.vmem_to_hbm [thread:$0]  (%p1463_p2), %s1078_s12, 256, %s2319_s20, [#allocation17], %s1854_s23, %s1854_s23, %s1855_s1  }
 0x5f1   : > { %1815 = dma.done.wait (%p1463_p2), [#allocation5], 256  }
 0x5f2   : > { %1817 = vsyncadd (%p1463_p2), [#allocation5], 4294967040 }
 0x5f3   : > { %1819 = dma.done.wait (%p1463_p2), [#allocation17], 256  }
 0x5f4   : > { %1821 = vsyncadd (%p1463_p2), [#allocation17], 4294967040 }
 0x5f5 PF: > { %s2320_s12 = sld [smem:[#allocation25_spill]]  ;;  %s2322_s30 = smov %s1828_s10 }
 0x5f6   : > { %s2321_s8 = sld [smem:[#allocation26_spill]]  ;;  %s2323_s10 = smov %s1832_s11 }
 0x5fb   : > { %p27_p7 = scmp.ge.s32.totalorder %s2320_s12, 4  }
 0x5fc   : > { %s2324_s11 = smov %s2321_s8 }
 0x5fd   :  { %29 = sbr.rel (!%p27_p7) target bundleno = 15 (0xf), region = 146 }
 0x602   :  { %1097 = vsyncpa [#allocation4], 1 }
 0x603   :  { %1099 = vsyncpa [#allocation4 + $0x1], 1 }
 0x604   :  { %1100 = vsyncpa [#allocation7], 1 }
 0x605   :  { %1101 = vsyncpa [#allocation10], 1 }
 0x606   :  { %1103 = vsyncpa [#allocation10 + $0x1], 1 }
 0x607   :  { %1104 = vsyncpa [#allocation13], 1 }
 0x608   :  { %1106 = vsyncpa [#allocation13 + $0x1], 1 }
 0x609   :  { %1107 = vsyncpa [#allocation5], 1 }
 0x60a   :  { %1109 = vsyncpa [#allocation5 + $0x1], 1 }
 0x60b   :  { %1110 = vsyncpa [#allocation17], 1 }

</bundles_post_ra>
